<compile_context>
chip_gen: v6e
topology: v6e:2x2x1
jax: 0.10.0
libtpu: 0.0.40
codegen_flags: <defaults>
</compile_context>

<pallas_src>
import math

import jax
import jax.numpy as jnp
from jax.experimental import pallas as pl
from jax.experimental.pallas import tpu as pltpu


def _make_attention_head_kernel(scale: float):
    def kernel(q_ref, k_ref, v_ref,
               wq_ref, bq_ref, wk_ref, bk_ref, wv_ref, bv_ref,
               o_ref,
               kT_cache, v_cache):
        qi = pl.program_id(1)

        # Project K/V once per batch element.  The q-tile axis is the innermost
        # ("arbitrary") grid axis, so this scratch persists across all q tiles
        # of the current batch element and is recomputed only when b advances.
        @pl.when(qi == 0)
        def _():
            xk = k_ref[0]                                            # (Sk, Din)
            xv = v_ref[0]                                            # (Sk, Din)
            K = jnp.dot(xk, wk_ref[...],
                        preferred_element_type=jnp.float32) + bk_ref[...]
            V = jnp.dot(xv, wv_ref[...],
                        preferred_element_type=jnp.float32) + bv_ref[...]
            # Store K transposed once: every q tile then runs a plain
            # (tq, Dq) @ (Dq, Sk) matmul with no per-tile transpose.
            kT_cache[...] = K.astype(kT_cache.dtype).T               # (Dq, Sk)
            v_cache[...] = V.astype(v_cache.dtype)                   # (Sk, Dk)

        xq = q_ref[0]                                                # (tq, Din)
        Q = jnp.dot(xq, wq_ref[...],
                    preferred_element_type=jnp.float32) + bq_ref[...]
        # Fold 1/sqrt(dim_q) into Q: tq*Dq VPU elems instead of tq*Sk.
        Q = Q * scale

        mxu_dtype = kT_cache.dtype   # bf16 inputs -> bf16 MXU feed, else f32
        scores = jnp.dot(Q.astype(mxu_dtype), kT_cache[...],
                         preferred_element_type=jnp.float32)         # (tq, Sk)
        out = jnp.dot(scores.astype(mxu_dtype), v_cache[...],
                      preferred_element_type=jnp.float32)            # (tq, Dk)
        o_ref[0] = out.astype(o_ref.dtype)

    return kernel


def _vmem_limit_bytes() -> int:
    """Generation-aware VMEM limit: 64 MiB on 128-MiB parts, ~48 MiB on v7x."""
    cap = 128 * 1024 * 1024
    try:
        cap = int(pltpu.get_tpu_info().vmem_capacity_bytes)
    except Exception:
        pass
    return min(64 * 1024 * 1024, (cap * 3) // 4)


def _pick_q_tile(sq: int, sk: int, din: int, dk: int,
                 itemsize: int, budget_bytes: int) -> int:
    """Largest q tile whose estimated VMEM footprint fits the budget."""
    f32 = 4

    def footprint(tq):
        q_in = 2 * tq * din * itemsize            # query tile (double buffered)
        kv_in = 2 * 2 * sk * din * itemsize       # key + value blocks (double buffered)
        caches = 2 * sk * dk * f32                # projected K^T / V caches
        scores = tq * sk * f32                    # (tq, Sk) intermediate
        out_b = 2 * tq * dk * itemsize            # output tile (double buffered)
        interm = 3 * max(tq, sk) * dk * f32       # Q/K/V projection intermediates
        weights = 2 * 3 * (din * dk + dk) * itemsize
        return q_in + kv_in + caches + scores + out_b + interm + weights

    if sq <= 1024 and footprint(sq) <= budget_bytes:
        return sq                                 # full-extent block (always legal)
    for tq in (1024, 512, 256, 128, 64, 32, 16, 8):
        if tq < sq and footprint(tq) <= budget_bytes:
            return tq
    return min(8, sq)


def attention_head(query, key, value, params, *, q_tile=None):
    """query: (B, Sq, Din), key/value: (B, Sk, Din). params: projection weights."""
    wq, bq = params["wq"], params["bq"]   # (Din, Dq), (1, Dq)
    wk, bk = params["wk"], params["bk"]   # (Din, Dk), (1, Dk)
    wv, bv = params["wv"], params["bv"]   # (Din, Dk), (1, Dk)

    B, Sq, Din = query.shape
    _, Sk, _ = key.shape
    Dq = wq.shape[1]
    Dk = wk.shape[1]
    assert Dq == Dk, f"dim_q ({Dq}) must equal dim_k ({Dk}) for Q @ K^T"
    assert key.shape == value.shape
    scale = 1.0 / math.sqrt(Dq)

    vmem_limit = _vmem_limit_bytes()
    if q_tile is None:
        tq = _pick_q_tile(Sq, Sk, Din, Dk, query.dtype.itemsize,
                          (vmem_limit * 7) // 10)
    else:
        tq = Sq if q_tile >= Sq else max(8, (q_tile // 8) * 8)
    n_q_tiles = pl.cdiv(Sq, tq)   # partial last tile -> masked output write

    # bf16 activations feed the MXU in bf16 (f32 accumulation); f32 stays f32
    # so the result matches the f32 reference (no softmax to bound scores).
    cache_dtype = (jnp.bfloat16
                   if jnp.dtype(query.dtype) == jnp.dtype(jnp.bfloat16)
                   else jnp.float32)

    kernel = _make_attention_head_kernel(scale)

    # Weights / biases: constant block index -> stay VMEM-resident, no re-DMA.
    const2d = lambda shape: pl.BlockSpec(shape, lambda b, qi: (0, 0))

    return pl.pallas_call(
        kernel,
        out_shape=jax.ShapeDtypeStruct((B, Sq, Dk), query.dtype),
        grid_spec=pltpu.PrefetchScalarGridSpec(
            num_scalar_prefetch=0,
            grid=(B, n_q_tiles),
            in_specs=[
                pl.BlockSpec((1, tq, Din), lambda b, qi: (b, qi, 0)),  # query tile
                pl.BlockSpec((1, Sk, Din), lambda b, qi: (b, 0, 0)),   # key (per-batch)
                pl.BlockSpec((1, Sk, Din), lambda b, qi: (b, 0, 0)),   # value (per-batch)
                const2d((Din, Dq)), const2d((1, Dq)),                  # Wq, bq
                const2d((Din, Dk)), const2d((1, Dk)),                  # Wk, bk
                const2d((Din, Dk)), const2d((1, Dk)),                  # Wv, bv
            ],
            out_specs=pl.BlockSpec((1, tq, Dk), lambda b, qi: (b, qi, 0)),
            scratch_shapes=[
                pltpu.VMEM((Dq, Sk), cache_dtype),   # K^T cache (per batch element)
                pltpu.VMEM((Sk, Dk), cache_dtype),   # V cache
            ],
        ),
        compiler_params=pltpu.CompilerParams(
            # Batch axis parallel (megacore on v7x); q-tile axis arbitrary so
            # the projected-K/V scratch persists across q tiles.
            dimension_semantics=("parallel", "arbitrary"),
            vmem_limit_bytes=vmem_limit),
    )(query, key, value, wq, bq, wk, bk, wv, bv)


def init_params(key, dim_in, dim_q, dim_k, dtype=jnp.float32):
    """Deterministic nn.Linear-style init; weights stored as (in, out)."""
    ks = jax.random.split(key, 6)
    bound = 1.0 / math.sqrt(dim_in)
    u = lambda k, shape: jax.random.uniform(k, shape, dtype, -bound, bound)
    return {
        "wq": u(ks[0], (dim_in, dim_q)), "bq": u(ks[1], (1, dim_q)),
        "wk": u(ks[2], (dim_in, dim_k)), "bk": u(ks[3], (1, dim_k)),
        "wv": u(ks[4], (dim_in, dim_k)), "bv": u(ks[5], (1, dim_k)),
    }


def attention_head_ref(query, key, value, params):
    """Pure-JAX reference mirroring the PyTorch module."""
    Q = query @ params["wq"] + params["bq"]
    K = key @ params["wk"] + params["bk"]
    V = value @ params["wv"] + params["bv"]
    scores = jnp.einsum("bqd,bkd->bqk", Q, K) / math.sqrt(Q.shape[-1])
    return jnp.einsum("bqk,bkd->bqd", scores, V)


if __name__ == "__main__":
    root = jax.random.PRNGKey(0)

    def run_case(B, Sq, Sk, Din, Dq, Dk, q_tile=None, seed_offset=0):
        kp, kq, kk, kv = jax.random.split(jax.random.fold_in(root, seed_offset), 4)
        params = init_params(kp, Din, Dq, Dk)
        query = jax.random.normal(kq, (B, Sq, Din), jnp.float32)
        key = jax.random.normal(kk, (B, Sk, Din), jnp.float32)
        value = jax.random.normal(kv, (B, Sk, Din), jnp.float32)

        out = jax.block_until_ready(
            attention_head(query, key, value, params, q_tile=q_tile))
        ref = attention_head_ref(query, key, value, params)
        assert out.shape == (B, Sq, Dk), out.shape
        err = float(jnp.max(jnp.abs(out - ref)))
        assert jnp.allclose(out, ref, atol=1e-4, rtol=1e-4), err

    # Base case (single q tile per batch element).
    run_case(B=2, Sq=8, Sk=8, Din=32, Dq=16, Dk=16)
    # Multiple q tiles per batch element: exercises the cached K^T/V projections.
    run_case(B=2, Sq=32, Sk=16, Din=32, Dq=16, Dk=16, q_tile=8, seed_offset=1)
    # Non-divisible Sq: partial (masked) last q tile.
    run_case(B=1, Sq=20, Sk=16, Din=32, Dq=16, Dk=16, q_tile=8, seed_offset=2)

    print("KERNEL_OK")
</pallas_src>

<mosaic_0001>
module attributes {stable_mosaic.version = 11 : i64} {
  func.func @kernel(%arg0: i32, %arg1: i32, %arg2: memref<1x8x32xf32, #tpu.memory_space<vmem>>, %arg3: memref<1x8x32xf32, #tpu.memory_space<vmem>>, %arg4: memref<1x8x32xf32, #tpu.memory_space<vmem>>, %arg5: memref<32x16xf32, #tpu.memory_space<vmem>>, %arg6: memref<1x16xf32, #tpu.memory_space<vmem>>, %arg7: memref<32x16xf32, #tpu.memory_space<vmem>>, %arg8: memref<1x16xf32, #tpu.memory_space<vmem>>, %arg9: memref<32x16xf32, #tpu.memory_space<vmem>>, %arg10: memref<1x16xf32, #tpu.memory_space<vmem>>, %arg11: memref<1x8x16xf32, #tpu.memory_space<vmem>>, %arg12: memref<16x8xf32, #tpu.memory_space<vmem>>, %arg13: memref<8x16xf32, #tpu.memory_space<vmem>>) attributes {dimension_semantics = [#tpu.dimension_semantics<parallel>, #tpu.dimension_semantics<arbitrary>], iteration_bounds = array<i64: 2, 1>, scalar_prefetch = 0 : i64, scratch_operands = 2 : i64, tpu.core_type = #tpu.core_type<tc>, window_params = [{transform_indices = @transform_0, window_bounds = array<i64: 1, 8, 32>}, {transform_indices = @transform_1, window_bounds = array<i64: 1, 8, 32>}, {transform_indices = @transform_2, window_bounds = array<i64: 1, 8, 32>}, {pipeline_mode = #tpu.pipeline_mode<synchronous>, transform_indices = @transform_3, window_bounds = array<i64: 32, 16>}, {pipeline_mode = #tpu.pipeline_mode<synchronous>, transform_indices = @transform_4, window_bounds = array<i64: 1, 16>}, {pipeline_mode = #tpu.pipeline_mode<synchronous>, transform_indices = @transform_5, window_bounds = array<i64: 32, 16>}, {pipeline_mode = #tpu.pipeline_mode<synchronous>, transform_indices = @transform_6, window_bounds = array<i64: 1, 16>}, {pipeline_mode = #tpu.pipeline_mode<synchronous>, transform_indices = @transform_7, window_bounds = array<i64: 32, 16>}, {pipeline_mode = #tpu.pipeline_mode<synchronous>, transform_indices = @transform_8, window_bounds = array<i64: 1, 16>}, {transform_indices = @transform_9, window_bounds = array<i64: 1, 8, 16>}]} {
    %c0_i32 = arith.constant 0 : i32
    %0 = arith.cmpi eq, %arg1, %c0_i32 : i32
    %1 = arith.extui %0 : i1 to i32
    %c0_i32_0 = arith.constant 0 : i32
    %2 = arith.cmpi ne, %1, %c0_i32_0 : i32
    scf.if %2 {
      %c0_17 = arith.constant 0 : index
      %c0_18 = arith.constant 0 : index
      %c0_19 = arith.constant 0 : index
      %19 = vector.load %arg3[%c0_17, %c0_18, %c0_19] : memref<1x8x32xf32, #tpu.memory_space<vmem>>, vector<1x8x32xf32>
      %20 = vector.shape_cast %19 : vector<1x8x32xf32> to vector<8x32xf32>
      %c0_20 = arith.constant 0 : index
      %c0_21 = arith.constant 0 : index
      %c0_22 = arith.constant 0 : index
      %21 = vector.load %arg4[%c0_20, %c0_21, %c0_22] : memref<1x8x32xf32, #tpu.memory_space<vmem>>, vector<1x8x32xf32>
      %22 = vector.shape_cast %21 : vector<1x8x32xf32> to vector<8x32xf32>
      %c0_23 = arith.constant 0 : index
      %c0_24 = arith.constant 0 : index
      %23 = vector.load %arg7[%c0_23, %c0_24] : memref<32x16xf32, #tpu.memory_space<vmem>>, vector<32x16xf32>
      %cst_25 = arith.constant dense<0.000000e+00> : vector<8x16xf32>
      %24 = tpu.matmul %20, %23, %cst_25 {dimension_numbers = #tpu.dot_dimension_numbers<[1], [0], [0], [1], [0, 0, 1, 1], [], []>} : vector<8x32xf32>, vector<32x16xf32>, vector<8x16xf32> -> vector<8x16xf32>
      %c0_26 = arith.constant 0 : index
      %c0_27 = arith.constant 0 : index
      %25 = vector.load %arg8[%c0_26, %c0_27] : memref<1x16xf32, #tpu.memory_space<vmem>>, vector<1x16xf32>
      %26 = vector.broadcast %25 : vector<1x16xf32> to vector<8x16xf32>
      %27 = arith.addf %24, %26 : vector<8x16xf32>
      %c0_28 = arith.constant 0 : index
      %c0_29 = arith.constant 0 : index
      %28 = vector.load %arg9[%c0_28, %c0_29] : memref<32x16xf32, #tpu.memory_space<vmem>>, vector<32x16xf32>
      %cst_30 = arith.constant dense<0.000000e+00> : vector<8x16xf32>
      %29 = tpu.matmul %22, %28, %cst_30 {dimension_numbers = #tpu.dot_dimension_numbers<[1], [0], [0], [1], [0, 0, 1, 1], [], []>} : vector<8x32xf32>, vector<32x16xf32>, vector<8x16xf32> -> vector<8x16xf32>
      %c0_31 = arith.constant 0 : index
      %c0_32 = arith.constant 0 : index
      %30 = vector.load %arg10[%c0_31, %c0_32] : memref<1x16xf32, #tpu.memory_space<vmem>>, vector<1x16xf32>
      %31 = vector.broadcast %30 : vector<1x16xf32> to vector<8x16xf32>
      %32 = arith.addf %29, %31 : vector<8x16xf32>
      %33 = tpu.transpose %27, [1, 0] : vector<8x16xf32> -> vector<16x8xf32>
      %c0_33 = arith.constant 0 : index
      %c0_34 = arith.constant 0 : index
      %34 = vector.load %arg12[%c0_33, %c0_34] : memref<16x8xf32, #tpu.memory_space<vmem>>, vector<16x8xf32>
      tpu.vector_store %arg12[%c0_33, %c0_34], %33 {strides = array<i32>} : memref<16x8xf32, #tpu.memory_space<vmem>>, vector<16x8xf32>,
      %c0_35 = arith.constant 0 : index
      %c0_36 = arith.constant 0 : index
      %35 = vector.load %arg13[%c0_35, %c0_36] : memref<8x16xf32, #tpu.memory_space<vmem>>, vector<8x16xf32>
      tpu.vector_store %arg13[%c0_35, %c0_36], %32 {strides = array<i32>} : memref<8x16xf32, #tpu.memory_space<vmem>>, vector<8x16xf32>,
    } else {
    }
    %c0 = arith.constant 0 : index
    %c0_1 = arith.constant 0 : index
    %c0_2 = arith.constant 0 : index
    %3 = vector.load %arg2[%c0, %c0_1, %c0_2] : memref<1x8x32xf32, #tpu.memory_space<vmem>>, vector<1x8x32xf32>
    %4 = vector.shape_cast %3 : vector<1x8x32xf32> to vector<8x32xf32>
    %c0_3 = arith.constant 0 : index
    %c0_4 = arith.constant 0 : index
    %5 = vector.load %arg5[%c0_3, %c0_4] : memref<32x16xf32, #tpu.memory_space<vmem>>, vector<32x16xf32>
    %cst = arith.constant dense<0.000000e+00> : vector<8x16xf32>
    %6 = tpu.matmul %4, %5, %cst {dimension_numbers = #tpu.dot_dimension_numbers<[1], [0], [0], [1], [0, 0, 1, 1], [], []>} : vector<8x32xf32>, vector<32x16xf32>, vector<8x16xf32> -> vector<8x16xf32>
    %c0_5 = arith.constant 0 : index
    %c0_6 = arith.constant 0 : index
    %7 = vector.load %arg6[%c0_5, %c0_6] : memref<1x16xf32, #tpu.memory_space<vmem>>, vector<1x16xf32>
    %8 = vector.broadcast %7 : vector<1x16xf32> to vector<8x16xf32>
    %9 = arith.addf %6, %8 : vector<8x16xf32>
    %cst_7 = arith.constant 2.500000e-01 : f32
    %10 = vector.broadcast %cst_7 : f32 to vector<8x16xf32>
    %11 = arith.mulf %9, %10 : vector<8x16xf32>
    %c0_8 = arith.constant 0 : index
    %c0_9 = arith.constant 0 : index
    %12 = vector.load %arg12[%c0_8, %c0_9] : memref<16x8xf32, #tpu.memory_space<vmem>>, vector<16x8xf32>
    %cst_10 = arith.constant dense<0.000000e+00> : vector<8x8xf32>
    %13 = tpu.matmul %11, %12, %cst_10 {dimension_numbers = #tpu.dot_dimension_numbers<[1], [0], [0], [1], [0, 0, 1, 1], [], []>} : vector<8x16xf32>, vector<16x8xf32>, vector<8x8xf32> -> vector<8x8xf32>
    %c0_11 = arith.constant 0 : index
    %c0_12 = arith.constant 0 : index
    %14 = vector.load %arg13[%c0_11, %c0_12] : memref<8x16xf32, #tpu.memory_space<vmem>>, vector<8x16xf32>
    %cst_13 = arith.constant dense<0.000000e+00> : vector<8x16xf32>
    %15 = tpu.matmul %13, %14, %cst_13 {dimension_numbers = #tpu.dot_dimension_numbers<[1], [0], [0], [1], [0, 0, 1, 1], [], []>} : vector<8x8xf32>, vector<8x16xf32>, vector<8x16xf32> -> vector<8x16xf32>
    %c0_14 = arith.constant 0 : index
    %c0_15 = arith.constant 0 : index
    %c0_16 = arith.constant 0 : index
    %16 = vector.load %arg11[%c0_14, %c0_15, %c0_16] : memref<1x8x16xf32, #tpu.memory_space<vmem>>, vector<1x8x16xf32>
    %17 = vector.shape_cast %16 : vector<1x8x16xf32> to vector<8x16xf32>
    %18 = vector.shape_cast %15 : vector<8x16xf32> to vector<1x8x16xf32>
    tpu.vector_store %arg11[%c0_14, %c0_15, %c0_16], %18 {strides = array<i32>} : memref<1x8x16xf32, #tpu.memory_space<vmem>>, vector<1x8x16xf32>,
    return
  }
  func.func @transform_0(%arg0: i32, %arg1: i32) -> (i32, i32, i32) {
    %c0_i32 = arith.constant 0 : i32
    %c0_i32_0 = arith.constant 0 : i32
    return %arg0, %arg1, %c0_i32 : i32, i32, i32
  }
  func.func @transform_1(%arg0: i32, %arg1: i32) -> (i32, i32, i32) {
    %c0_i32 = arith.constant 0 : i32
    %c0_i32_0 = arith.constant 0 : i32
    %c0_i32_1 = arith.constant 0 : i32
    return %arg0, %c0_i32, %c0_i32_0 : i32, i32, i32
  }
  func.func @transform_2(%arg0: i32, %arg1: i32) -> (i32, i32, i32) {
    %c0_i32 = arith.constant 0 : i32
    %c0_i32_0 = arith.constant 0 : i32
    %c0_i32_1 = arith.constant 0 : i32
    return %arg0, %c0_i32, %c0_i32_0 : i32, i32, i32
  }
  func.func @transform_3(%arg0: i32, %arg1: i32) -> (i32, i32) {
    %c0_i32 = arith.constant 0 : i32
    %c0_i32_0 = arith.constant 0 : i32
    %c0_i32_1 = arith.constant 0 : i32
    return %c0_i32, %c0_i32_0 : i32, i32
  }
  func.func @transform_4(%arg0: i32, %arg1: i32) -> (i32, i32) {
    %c0_i32 = arith.constant 0 : i32
    %c0_i32_0 = arith.constant 0 : i32
    %c0_i32_1 = arith.constant 0 : i32
    return %c0_i32, %c0_i32_0 : i32, i32
  }
  func.func @transform_5(%arg0: i32, %arg1: i32) -> (i32, i32) {
    %c0_i32 = arith.constant 0 : i32
    %c0_i32_0 = arith.constant 0 : i32
    %c0_i32_1 = arith.constant 0 : i32
    return %c0_i32, %c0_i32_0 : i32, i32
  }
  func.func @transform_6(%arg0: i32, %arg1: i32) -> (i32, i32) {
    %c0_i32 = arith.constant 0 : i32
    %c0_i32_0 = arith.constant 0 : i32
    %c0_i32_1 = arith.constant 0 : i32
    return %c0_i32, %c0_i32_0 : i32, i32
  }
  func.func @transform_7(%arg0: i32, %arg1: i32) -> (i32, i32) {
    %c0_i32 = arith.constant 0 : i32
    %c0_i32_0 = arith.constant 0 : i32
    %c0_i32_1 = arith.constant 0 : i32
    return %c0_i32, %c0_i32_0 : i32, i32
  }
  func.func @transform_8(%arg0: i32, %arg1: i32) -> (i32, i32) {
    %c0_i32 = arith.constant 0 : i32
    %c0_i32_0 = arith.constant 0 : i32
    %c0_i32_1 = arith.constant 0 : i32
    return %c0_i32, %c0_i32_0 : i32, i32
  }
  func.func @transform_9(%arg0: i32, %arg1: i32) -> (i32, i32, i32) {
    %c0_i32 = arith.constant 0 : i32
    %c0_i32_0 = arith.constant 0 : i32
    return %arg0, %arg1, %c0_i32 : i32, i32, i32
  }
}

</mosaic_0001>

<bundles_post_ra>
// kernel: tpu_custom_call.1
= control target key start
LH: loop header
LB: loop body
LE: loop exit
PB: predicated region body
PF: predicated region fallthrough
CT: control target
= control target key end

     0   :  { %14 = vsyncpa [#allocation5], 0  ;;  %s1423_s0 = inlined_call_operand.vmem [shape: f32[2,8,32], index: 0, kind: input, shape index: {}]   ;;  %s1424_s1 = inlined_call_operand.vmem [shape: f32[2,8,32], index: 1, kind: input, shape index: {}]   ;;  %s1425_s2 = inlined_call_operand.vmem [shape: f32[2,8,32], index: 2, kind: input, shape index: {}]   ;;  %s1426_s3 = inlined_call_operand.vmem [shape: f32[32,16], index: 3, kind: input, shape index: {}]   ;;  %s1427_s4 = inlined_call_operand.vmem [shape: f32[1,16], index: 4, kind: input, shape index: {}]   ;;  %s1428_s5 = inlined_call_operand.vmem [shape: f32[32,16], index: 5, kind: input, shape index: {}]   ;;  %s1429_s6 = inlined_call_operand.vmem [shape: f32[1,16], index: 6, kind: input, shape index: {}]   ;;  %s1430_s7 = inlined_call_operand.vmem [shape: f32[32,16], index: 7, kind: input, shape index: {}]   ;;  %s1431_s8 = inlined_call_operand.vmem [shape: f32[1,16], index: 8, kind: input, shape index: {}]   ;;  %s1432_s9 = inlined_call_operand.hbm [shape: f32[2,8,16], index: 9, kind: output, shape index: {}]  }
   0x1   :  { %16 = vsyncpa [#allocation5 + $0x1], 0  ;;  %s1222_s30 = smov 0   ;;  %s1224_s10 = smov 0  }
   0x2   :  { %s1226_s11 = smov 0   ;;  %s1228_s12 = smov 0  }
   0x3   :  { %s1230_s13 = smov 0   ;;  %s1232_s14 = smov 0  }
   0x4 LB: > { %s948_s15 = sadd.s32 4294967295, %s1167_s14   ;;  %s949_s16 = sadd.s32 4294967294, %s1167_s14   ;;  %s1167_s14 = sphi %s1232_s14, %s22_s14   ;;  %s1163_s13 = sphi %s1230_s13, %s1439_s13   ;;  %s1159_s12 = sphi %s1228_s12, %s1438_s12   ;;  %s1155_s11 = sphi %s1226_s11, %s1437_s11   ;;  %s1151_s10 = sphi %s1224_s10, %s1436_s10   ;;  %s1147_s30 = sphi %s1222_s30, %s1435_s30  }
   0x5   : > { %s34_s17 = sadd.s32 1, %s1163_s13  ;;  %s249_s18 = sadd.s32 1, %s1155_s11 }
   0x6   : > { %p36_p0 = scmp.ge.s32.totalorder %s34_s17, 2  ;;  %p259_p1 = scmp.ne.s32.totalorder %s1155_s11, %s1151_s10 }
   0x7   : > { %p260_p2 = scmp.eq.s32.totalorder %s948_s15, 1  ;;  %p265_p3 = scmp.ne.s32.totalorder %s1151_s10, %s1147_s30 }
   0x8   : > { %s1441_s17 = smov (%p36_p0, %s34_s17), 0  ;;  %p266_p5 = scmp.eq.s32.totalorder %s949_s16, 1 }
   0x9   : > { %p1262_p4 = por %p260_p2, %p259_p1  ;;  %s244_s20 = ssub.s32 %s1163_s13, %s1441_s17 }
   0xa   : > { %p952_p6 = scmp.ge.s32.totalorder %s1167_s14, 1  ;;  %p247_p7 = scmp.eq.s32.totalorder %s244_s20, 0 }
   0xb   : > { %p1269_p8 = por %p266_p5, %p265_p3  ;;  %p326_p9 = scmp.lt.s32.totalorder %s1167_s14, 3 }
   0xc   : > { %s1275_s22 = scalar_select %p247_p7, %s1155_s11, %s249_s18  }
   0xd   : > { %p327_p10 = pnand %p952_p6, %p326_p9 }
   0xe   : > { %p372_p11 = scmp.lt.s32.totalorder (!%p327_p10), %s1159_s12, 1  ;;  %s369_s20 = sand.u32 (!%p327_p10), 1, %s1151_s10  }
   0xf   : > { %330 = sbr.rel (%p327_p10) target bundleno = 764 (0x2fc), region = 56 }
  0x14   : > { %v396_v0 = vld [vmem:[%s1428_s5 + $0x18] sm:$0xff]  ;;  %v1169_v1 = vmov 0.0   ;;  %v395_v2 = vld [vmem:[%s1428_s5 + $0x10] sm:$0xff]  ;;  %vm1170_vm0 = vmmov 0   ;;  %s373_s27 = scalar_select %p372_p11, %s1159_s12, 1  ;;  %v394_v3 = vld [vmem:[%s1428_s5 + $0x8] sm:$0xff] }
  0x15   : > { %989 = vmatprep.subr.mxu0 %v1169_v1  ;;  %997 = vmatprep.mubr.msk.f32.mxu0 %vm1170_vm0, %v1169_v1  ;;  %v393_v4 = vld [vmem:[%s1428_s5] sm:$0xff]  ;;  %vm404_vm1 = vcmask 261120   ;;  %v603_v6 = vld [vmem:[%s1426_s3 + $0x18] sm:$0xff]  ;;  %v602_v7 = vld [vmem:[%s1426_s3 + $0x10] sm:$0xff]  ;;  %vm594_vm2 = vcmask 64512   ;;  %vm597_vm3 = vcmask 130048  }
  0x16   : > { %990 = vmatpush3.msra.mxu0 %v396_v0  ;;  %1000 = vmatprep.subr.mxu1 %v1169_v1  ;;  %s1295_s15 = sshll.u32 %s373_s27, 3  ;;  %v601_v8 = vld [vmem:[%s1426_s3 + $0x8] sm:$0xff]  ;;  %v600_v9 = vld [vmem:[%s1426_s3] sm:$0xff]  ;;  %v481_v11 = vld [vmem:[%s1430_s7 + $0x18] sm:$0xff] }
  0x17   : > { %991 = vmatprep.subr.mxu0 %v1169_v1  ;;  %1008 = vmatprep.mubr.msk.f32.mxu1 %vm1170_vm0, %v1169_v1  ;;  %s382_s24 = scalar_lea.vmem %s1424_s1, %s1295_s15  ;;  %s378_s23 = scalar_lea.vmem %s1423_s0, %s1295_s15  ;;  %v480_v12 = vld [vmem:[%s1430_s7 + $0x10] sm:$0xff]  ;;  %v479_v13 = vld [vmem:[%s1430_s7 + $0x8] sm:$0xff]  ;;  %v478_v14 = vld [vmem:[%s1430_s7] sm:$0xff] }
  0x18   : > { %992 = vmatpush3.msra.mxu0 %v395_v2  ;;  %v391_v5 = vld [vmem:[%s382_s24] sm:$0xff]  ;;  %1001 = vmatpush3.msra.mxu1 %v481_v11  ;;  %s386_s28 = scalar_lea.vmem %s1425_s2, %s1295_s15  ;;  %s966_s24 = sshll.u32 %s1159_s12, 7 }
  0x19   : > { %993 = vmatprep.subr.mxu0 %v1169_v1  ;;  %v599_v10 = vld [vmem:[%s378_s23] sm:$0xff]  ;;  %1002 = vmatprep.subr.mxu1 %v1169_v1  ;;  %s953_s23 = sshll.u32 %s369_s20, 3  ;;  %s1376_s29 = scalar_lea.hbm %s1432_s9, %s966_s24 }
  0x1a   : > { %994 = vmatpush3.msra.mxu0 %v394_v3  ;;  %1003 = vmatpush3.msra.mxu1 %v480_v12  ;;  %v957_v15 = vld [vmem:[%s1429_s6] ss:$0 sm:$0xff]  ;;  %s371_s25 = scalar_lea.vmem [#allocation4], %s953_s23  ;;  %s839_s15 = scalar_lea.sflag [#allocation5], %s369_s20 }
  0x1b   : > { %995 = vmatprep.subr.mxu0 %v1169_v1  ;;  %1004 = vmatprep.subr.mxu1 %v1169_v1  ;;  %v392_v18 = vld [vmem:[%s386_s28] sm:$0xff]  ;;  %s853_s26 = sshll.u32 %s371_s25, 4  ;;  %s1171_s12 = smov [#allocation4]   ;;  %s1378_s26 = int_to_ptr.vmem [resolvable:$true] %s853_s26 }
  0x1c   : > { %996 = vmatpush3.msra.mxu0 %v393_v4  ;;  %1005 = vmatpush3.msra.mxu1 %v479_v13  ;;  %v961_v24 = vld [vmem:[%s1427_s4] ss:$0 sm:$0xff]  ;;  %s1091_s16 = scalar_lea.vmem %s1378_s26, 128  ;;  %s1095_s18 = sshll.u32 %s1171_s12, 4  ;;  %s1096_s18 = int_to_ptr.vmem [resolvable:$false] %s1095_s18 }
  0x1d   : > { %998 = vmatmul.mubr.msk.f32.vlgmr.msra.gmra.mxu0 %vm404_vm1, %v391_v5  ;;  %1011 = vmatprep.subr.mxu0 %v1169_v1  ;;  %v959_v29 = vld [vmem:[%s1431_s8] ss:$0 sm:$0xff]  ;;  %p1092_p12 = scmp.ne.s32.totalorder %s1378_s26, %s1091_s16  ;;  %s1097_s23 = scalar_lea.vmem %s1096_s18, 256 }
  0x1e   : > { %1012 = vmatpush3.msra.mxu0 %v603_v6  ;;  %1019 = vmatprep.mubr.msk.f32.mxu0 %vm1170_vm0, %v1169_v1  ;;  %p1098_p1 = scmp.lt.s32.totalorder %s1378_s26, %s1096_s18  ;;  %p1099_p2 = scmp.lt.s32.totalorder %s1097_s23, %s1091_s16 }
  0x1f   : > { %1013 = vmatprep.subr.mxu0 %v1169_v1  ;;  %1006 = vmatprep.subr.mxu1 %v1169_v1  ;;  %p1093_p13 = pnand %p1092_p12, %p1262_p4 }
  0x20   : > { %1014 = vmatpush3.msra.mxu0 %v602_v7  ;;  %1007 = vmatpush3.msra.mxu1 %v478_v14  ;;  %p1100_p3 = por %p1099_p2, %p1098_p1 }
  0x21   : > { %1015 = vmatprep.subr.mxu0 %v1169_v1  ;;  %1022 = vmatprep.subr.mxu1 %v1169_v1  ;;  %p1094_p0 = pneg %p1093_p13 }
  0x22   : > { %1016 = vmatpush3.msra.mxu0 %v601_v8  ;;  %1009 = vmatmul.mubr.msk.f32.vlgmr.msra.gmra.mxu1 %vm404_vm1, %v392_v18 }
  0x23   : > { %1017 = vmatprep.subr.mxu0 %v1169_v1  ;;  %1026 = vmatprep.mubr.msk.f32.mxu1 %vm1170_vm0, %v1169_v1  ;;  %p1101_p5 = pnand %p1100_p3, %p1094_p0 }
  0x24   : > { %1018 = vmatpush3.msra.mxu0 %v600_v9 }
  0x25   : > { %1020 = vmatmul.mubr.msk.f32.vlgmr.msra.gmra.mxu0 %vm404_vm1, %v599_v10 }
  0xdd   : > { %v474_v16 = vpop.f32.mrf.mxu0 }
  0xde   : > { %v475_v17 = vadd.f32 %v957_v15, %v474_v16 }
  0xdf   : > { %v999_v19 = vpop.f32.mrf.mxu0 }
  0xe0   : > { %562 = vxpose.xlu0.b32.start.end [1/1] (short) (narrow) %v475_v17, 16 }
  0xe2   : > { %v558_v30 = vpop.f32.mrf.mxu1 }
  0xe3   : > { %v559_v31 = vadd.f32 %v959_v29, %v558_v30 }
  0xe4   : > { %v1010_v32 = vpop.f32.mrf.mxu1 }
  0xe5   : > { %v681_v20 = vpop.f32.mrf.mxu0  ;;  %598 = vst.msk [vmem:[#allocation3] sm:$0xff] %vm597_vm3, %v559_v31 }
  0xe6   : > { %v682_v25 = vadd.f32 %v961_v24, %v681_v20 }
  0xe7   : > { %v1021_v21 = vpop.f32.mrf.mxu0 }
  0xe8   : > { %v685_v26 = vmul.f32 0.25, %v682_v25 }
  0xec   : > { %v762_v33 = vld [vmem:[#allocation3] sm:$0xff] }
 0x15c   : > { %v578_v22 = vpop.trf.xlu0 }
 0x15d   : > { %595 = vst.msk [vmem:[#allocation2] sm:$0xff] %vm594_vm2, %v578_v22 }
 0x160   : > { %v579_v23 = vpop.trf.xlu0 }
 0x161   : > { %596 = vst.msk [vmem:[#allocation2 + $0x8] sm:$0xff] %vm594_vm2, %v579_v23 }
 0x164   : > { %v686_v28 = vld [vmem:[#allocation2] sm:$0xff] }
 0x168   : > { %v687_v27 = vld [vmem:[#allocation2 + $0x8] sm:$0xff] }
 0x169   : > { %1023 = vmatpush3.msra.mxu1 %v687_v27 }
 0x16a   : > { %1024 = vmatprep.subr.mxu1 %v1169_v1 }
 0x16b   : > { %1025 = vmatpush3.msra.mxu1 %v686_v28 }
 0x16c   : > { %1027 = vmatmul.mubr.msk.f32.vlgmr.msra.gmra.mxu1 %vm597_vm3, %v685_v26  ;;  %1029 = vmatprep.subr.mxu1 %v1169_v1 }
 0x16d   : > { %1031 = vmatprep.mubr.msk.f32.mxu1 %vm1170_vm0, %v1169_v1  ;;  %1030 = vmatpush3.msra.mxu1 %v762_v33 }
 0x22c   : > { %v758_v34 = vpop.f32.mrf.mxu1 }
 0x22d   : > { %1032 = vmatmul.mubr.msk.f32.vlgmr.msra.gmra.mxu1 %vm594_vm2, %v758_v34 }
 0x22e   : > { %v1028_v35 = vpop.f32.mrf.mxu1 }
 0x2ed   : > { %v833_v36 = vpop.f32.mrf.mxu1 }
 0x2ee   : > { %837 = vst.msk [vmem:[%s371_s25] sm:$0xff] %vm597_vm3, %v833_v36 }
 0x2ef   : > { %v1033_v37 = vpop.f32.mrf.mxu1 }
 0x2f0   : > { %1104 = shalt.err (!%p1101_p5)
}
 0x2f1   : > { %s1105_s24 = scalar_lea.hbm %s1376_s29, 128  ;;  %s1109_s27 = scalar_lea.hbm %s1432_s9, 256 }
 0x2f2   : > { %p1106_p6 = scmp.ne.s32.totalorder %s1376_s29, %s1105_s24  ;;  %p1110_p10 = scmp.lt.s32.totalorder %s1376_s29, %s1432_s9 }
 0x2f3   : > { %p1111_p11 = scmp.lt.s32.totalorder %s1109_s27, %s1105_s24 }
 0x2f4   : > { %p1107_p7 = pnand %p1106_p6, %p1262_p4 }
 0x2f5   : > { %p1112_p12 = por %p1111_p11, %p1110_p10 }
 0x2f6   : > { %p1108_p9 = pneg %p1107_p7 }
 0x2f8   : > { %p1113_p13 = pnand %p1112_p12, %p1108_p9 }
 0x2fa   : > { %1116 = shalt.err (!%p1113_p13)
}
 0x2fb   : > { %1034 = dma.vmem_to_hbm [thread:$0]  (%p1262_p4), %s1378_s26, 128, %s1376_s29, %s839_s15  }
 0x2fc PF: > { %p1040_p0 = scmp.ge.s32.totalorder %s1167_s14, 2  ;;  %s865_s16 = sand.u32 1, %s1147_s30  }
 0x2fd   : > { %s866_s18 = scalar_lea.sflag [#allocation5], %s865_s16 }
 0x2fe   : > { %p1037_p1 = pnand %p1040_p0, %p1269_p8 }
 0x300   : > { %p1038_p2 = pneg %p1037_p1 }
 0x302   : > { %1142 = dma.done.wait (%p1038_p2), %s866_s18, 128  }
 0x303   : > { %1144 = vsyncadd (%p1038_p2), %s866_s18, 4294967168  ;;  %s22_s14 = sadd.s32 1, %s1167_s14   ;;  %s1435_s30 = smov %s1151_s10 }
 0x304   : > { %p19_p3 = scmp.ge.s32.totalorder %s22_s14, 4   ;;  %s1436_s10 = smov %s1155_s11 }
 0x305   : > { %s1437_s11 = smov %s1275_s22  ;;  %s1438_s12 = smov %s1163_s13 }
 0x306   : > { %s1439_s13 = smov %s1441_s17  ;;  %21 = sbr.rel (!%p19_p3) target bundleno = 4 (0x4), region = 101 }
 0x30b   :  { %871 = vsyncpa [#allocation5], 1 }
 0x30c   :  { %873 = vsyncpa [#allocation5 + $0x1], 1 }

</bundles_post_ra>
